<compile_context>
chip_gen: v7x
topology: tpu7x:2x2x1
jax: 0.10.0
libtpu: 0.0.40
codegen_flags: <defaults>
</compile_context>

<pallas_src>
import functools

import jax
import jax.numpy as jnp
from jax import lax
from jax.experimental import pallas as pl
from jax.experimental.pallas import tpu as pltpu  # noqa: F401  (kept for parity / future CompilerParams)

BN_EPS = 1e-5
D_PAD = 128  # lane width: every feature dimension is zero-padded to this


def _full_spec(shape):
    # Whole-array block (block_shape == array shape satisfies the (8,128) rule).
    return pl.BlockSpec(shape, lambda: tuple(0 for _ in shape))


def _make_fused_kernel(num_layers):
    """Fused MLP kernel for a fixed layer count (Python loop unrolls at trace time).

    Refs:
      x       [N, d_in0]            f32
      w_first [d_in0, D_PAD]        bf16   (layer-0 weight, output cols padded)
      w_rest  [num_layers-1, D_PAD, D_PAD] bf16 (layers 1..L-1, fully padded)
      bn_bias [2*(num_layers-1)+1, D_PAD]  f32
              rows 2i / 2i+1 = gamma_i / beta_i (0 in padded cols),
              last row       = final Linear bias (0 in padded cols)
      out     [N, D_PAD]            f32
    """
    num_hidden = num_layers - 1

    def kernel(x_ref, w0_ref, wr_ref, bnb_ref, o_ref):
        h = x_ref[...]                                    # f32 activations
        for i in range(num_hidden):
            w = w0_ref[...] if i == 0 else wr_ref[i - 1]  # bf16 weight tile
            # Linear (hidden bias omitted: cancelled exactly by BN mean subtraction).
            y = jnp.dot(h.astype(jnp.bfloat16), w,
                        preferred_element_type=jnp.float32)

            gamma = bnb_ref[2 * i: 2 * i + 1, :]          # [1, D_PAD] f32
            beta = bnb_ref[2 * i + 1: 2 * i + 2, :]       # [1, D_PAD] f32

            # BatchNorm1d, training mode: biased batch stats over axis 0 (f32).
            mean = jnp.mean(y, axis=0, keepdims=True)
            diff = y - mean
            var = jnp.mean(diff * diff, axis=0, keepdims=True)
            scale = gamma * lax.rsqrt(var + BN_EPS)       # gamma folded into rsqrt

            # ReLU; Dropout(p=0) is the identity.  Padded cols: gamma=beta=0 -> 0.
            h = jnp.maximum(diff * scale + beta, 0.0)

        w_last = wr_ref[num_hidden - 1]
        b_last = bnb_ref[2 * num_hidden: 2 * num_hidden + 1, :]
        y = jnp.dot(h.astype(jnp.bfloat16), w_last,
                    preferred_element_type=jnp.float32) + b_last
        o_ref[...] = y.astype(o_ref.dtype)

    return kernel


@functools.partial(jax.jit, static_argnames=("d_out",))
def mlp_egc_forward(feats, w_first, w_rest, bn_bias, *, d_out):
    """Fused forward: one grid-less pallas_call, lane-dense [N, 128] slab output."""
    num_layers = w_rest.shape[0] + 1
    n = feats.shape[0]

    out_pad = pl.pallas_call(
        _make_fused_kernel(num_layers),
        out_shape=jax.ShapeDtypeStruct((n, D_PAD), feats.dtype),
        in_specs=[
            _full_spec(feats.shape),
            _full_spec(w_first.shape),
            _full_spec(w_rest.shape),
            _full_spec(bn_bias.shape),
        ],
        out_specs=_full_spec((n, D_PAD)),
    )(feats, w_first, w_rest, bn_bias)

    return out_pad[:, :d_out]


def init_mlp_egc_params(key, layers):
    """Deterministic parameter init matching nn.Linear / nn.BatchNorm1d shapes.

    Weights are stored [d_in, d_out] (transpose of PyTorch's [out, in]) so the
    kernel computes x @ W + b directly on the MXU.
    """
    params = []
    num_layers = len(layers) - 1
    for i in range(num_layers):
        d_in, d_out = layers[i], layers[i + 1]
        key, kw, kb = jax.random.split(key, 3)
        bound = 1.0 / jnp.sqrt(jnp.float32(d_in))
        w = jax.random.uniform(kw, (d_in, d_out), jnp.float32, -bound, bound)
        b = jax.random.uniform(kb, (1, d_out), jnp.float32, -bound, bound)
        if i < num_layers - 1:
            gamma = jnp.ones((1, d_out), jnp.float32)   # BN weight init
            beta = jnp.zeros((1, d_out), jnp.float32)   # BN bias init
            params.append({"w": w, "b": b, "gamma": gamma, "beta": beta})
        else:
            params.append({"w": w, "b": b})
    return params


def pack_mlp_egc_params(params, d_pad=D_PAD):
    """Pack all parameters into 3 kernel inputs (done ONCE at param-build time).

    Returns (w_first bf16, w_rest bf16, bn_bias f32, d_out_final).
    Feature dims are zero-padded to d_pad; gamma/beta/bias padding is 0 so
    padded lanes stay exactly 0 through BN/ReLU and the final Linear.
    """
    num_layers = len(params)
    assert num_layers >= 2, "fused kernel expects at least 2 Linear layers"
    num_hidden = num_layers - 1

    def pad_w_full(w):
        di, do = w.shape
        return jnp.zeros((d_pad, d_pad), jnp.float32).at[:di, :do].set(w)

    def pad_row(v):
        v = v.reshape(-1)
        return jnp.zeros((d_pad,), jnp.float32).at[: v.shape[0]].set(v)

    # First-layer weight: input dim left as-is, output dim padded.
    w0 = params[0]["w"]
    d_in0, d_out0 = w0.shape
    w_first = (jnp.zeros((d_in0, d_pad), jnp.float32)
               .at[:, :d_out0].set(w0)).astype(jnp.bfloat16)

    # Remaining weights stacked into one blob.
    w_rest = jnp.stack([pad_w_full(params[i]["w"]) for i in range(1, num_layers)])
    w_rest = w_rest.astype(jnp.bfloat16)

    # BN scale/shift rows + final bias row (hidden biases intentionally excluded:
    # exact under training-mode BN).
    rows = []
    for i in range(num_hidden):
        rows.append(pad_row(params[i]["gamma"]))
        rows.append(pad_row(params[i]["beta"]))
    rows.append(pad_row(params[-1]["b"]))
    bn_bias = jnp.stack(rows)   # [2*num_hidden + 1, d_pad] f32

    d_out_final = params[-1]["w"].shape[1]
    return w_first, w_rest, bn_bias, d_out_final


def mlp_egc_reference(feats, params, quantize_matmul=False):
    """Pure-JAX reference of the module (training-mode BN, hidden bias included).

    quantize_matmul=True rounds matmul operands to bf16 (mirroring the kernel's
    deliberate bf16 weight/operand quantization) so the comparison isolates
    kernel correctness from that quantization choice.
    """
    def mm(a, b):
        if quantize_matmul:
            a = a.astype(jnp.bfloat16).astype(jnp.float32)
            b = b.astype(jnp.bfloat16).astype(jnp.float32)
        return jnp.dot(a, b, preferred_element_type=jnp.float32)

    num_layers = len(params)
    for i in range(num_layers - 1):
        layer = params[i]
        y = mm(feats, layer["w"]) + layer["b"]
        mean = jnp.mean(y, axis=0, keepdims=True)
        var = jnp.mean((y - mean) ** 2, axis=0, keepdims=True)
        y = (y - mean) / jnp.sqrt(var + BN_EPS) * layer["gamma"] + layer["beta"]
        feats = jnp.maximum(y, 0.0)
    layer = params[-1]
    return mm(feats, layer["w"]) + layer["b"]


if __name__ == "__main__":
    key = jax.random.PRNGKey(0)
    k_x, k_p = jax.random.split(key)

    layers = [32, 64, 64, 16]   # 3 Linear layers, 2 BatchNorm1d layers
    n = 64                      # batch of node features

    feats = jax.random.normal(k_x, (n, layers[0]), jnp.float32)
    params = init_mlp_egc_params(k_p, layers)
    w_first, w_rest, bn_bias, d_out = pack_mlp_egc_params(params)

    out = mlp_egc_forward(feats, w_first, w_rest, bn_bias, d_out=d_out)
    out = jax.block_until_ready(out)
    assert out.shape == (n, layers[-1])

    # Tight check: same bf16 matmul-operand rounding as the kernel.
    ref_q = mlp_egc_reference(feats, params, quantize_matmul=True)
    assert jnp.allclose(out, ref_q, atol=5e-3, rtol=5e-3), "mismatch vs bf16-operand reference"

    # Loose check: full-f32 module semantics (only bf16 quantization differs).
    ref = mlp_egc_reference(feats, params, quantize_matmul=False)
    assert jnp.allclose(out, ref, atol=5e-2, rtol=5e-2), "mismatch vs f32 reference"

    print("KERNEL_OK")
</pallas_src>

<mosaic_0001>
module attributes {stable_mosaic.version = 11 : i64} {
  func.func @kernel(%arg0: memref<64x32xf32, #tpu.memory_space<vmem>>, %arg1: memref<32x128xbf16, #tpu.memory_space<vmem>>, %arg2: memref<2x128x128xbf16, #tpu.memory_space<vmem>>, %arg3: memref<5x128xf32, #tpu.memory_space<vmem>>, %arg4: memref<64x128xf32, #tpu.memory_space<vmem>>) attributes {dimension_semantics = [], scalar_prefetch = 0 : i64, scratch_operands = 0 : i64, tpu.core_type = #tpu.core_type<tc>} {
    %c0 = arith.constant 0 : index
    %c0_0 = arith.constant 0 : index
    %0 = vector.load %arg0[%c0, %c0_0] : memref<64x32xf32, #tpu.memory_space<vmem>>, vector<64x32xf32>
    %c0_1 = arith.constant 0 : index
    %c0_2 = arith.constant 0 : index
    %1 = vector.load %arg1[%c0_1, %c0_2] : memref<32x128xbf16, #tpu.memory_space<vmem>>, vector<32x128xbf16>
    %2 = arith.truncf %0 : vector<64x32xf32> to vector<64x32xbf16>
    %cst = arith.constant dense<0.000000e+00> : vector<64x128xf32>
    %3 = tpu.matmul %2, %1, %cst {dimension_numbers = #tpu.dot_dimension_numbers<[1], [0], [0], [1], [0, 0, 1, 1], [], []>} : vector<64x32xbf16>, vector<32x128xbf16>, vector<64x128xf32> -> vector<64x128xf32>
    %c0_3 = arith.constant 0 : index
    %c0_4 = arith.constant 0 : index
    %4 = vector.load %arg3[%c0_3, %c0_4] : memref<5x128xf32, #tpu.memory_space<vmem>>, vector<1x128xf32>
    %c1 = arith.constant 1 : index
    %c0_5 = arith.constant 0 : index
    %5 = vector.load %arg3[%c1, %c0_5] : memref<5x128xf32, #tpu.memory_space<vmem>>, vector<1x128xf32>
    %cst_6 = arith.constant dense<0.000000e+00> : vector<128xf32>
    %6 = vector.multi_reduction <add>, %3, %cst_6 [0] : vector<64x128xf32> to vector<128xf32>
    %7 = vector.shape_cast %6 : vector<128xf32> to vector<1x128xf32>
    %cst_7 = arith.constant 6.400000e+01 : f32
    %8 = vector.broadcast %cst_7 : f32 to vector<1x128xf32>
    %9 = arith.divf %7, %8 : vector<1x128xf32>
    %10 = vector.broadcast %9 : vector<1x128xf32> to vector<64x128xf32>
    %11 = arith.subf %3, %10 : vector<64x128xf32>
    %12 = arith.mulf %11, %11 : vector<64x128xf32>
    %cst_8 = arith.constant dense<0.000000e+00> : vector<128xf32>
    %13 = vector.multi_reduction <add>, %12, %cst_8 [0] : vector<64x128xf32> to vector<128xf32>
    %14 = vector.shape_cast %13 : vector<128xf32> to vector<1x128xf32>
    %cst_9 = arith.constant 6.400000e+01 : f32
    %15 = vector.broadcast %cst_9 : f32 to vector<1x128xf32>
    %16 = arith.divf %14, %15 : vector<1x128xf32>
    %cst_10 = arith.constant 9.99999974E-6 : f32
    %17 = vector.broadcast %cst_10 : f32 to vector<1x128xf32>
    %18 = arith.addf %16, %17 : vector<1x128xf32>
    %19 = math.rsqrt %18 : vector<1x128xf32>
    %20 = arith.mulf %4, %19 : vector<1x128xf32>
    %21 = vector.broadcast %20 : vector<1x128xf32> to vector<64x128xf32>
    %22 = arith.mulf %11, %21 : vector<64x128xf32>
    %23 = vector.broadcast %5 : vector<1x128xf32> to vector<64x128xf32>
    %24 = arith.addf %22, %23 : vector<64x128xf32>
    %cst_11 = arith.constant 0.000000e+00 : f32
    %25 = vector.broadcast %cst_11 : f32 to vector<64x128xf32>
    %26 = arith.maximumf %24, %25 : vector<64x128xf32>
    %c0_12 = arith.constant 0 : index
    %c0_13 = arith.constant 0 : index
    %c0_14 = arith.constant 0 : index
    %27 = vector.load %arg2[%c0_12, %c0_13, %c0_14] : memref<2x128x128xbf16, #tpu.memory_space<vmem>>, vector<1x128x128xbf16>
    %28 = vector.shape_cast %27 : vector<1x128x128xbf16> to vector<128x128xbf16>
    %29 = arith.truncf %26 : vector<64x128xf32> to vector<64x128xbf16>
    %cst_15 = arith.constant dense<0.000000e+00> : vector<64x128xf32>
    %30 = tpu.matmul %29, %28, %cst_15 {dimension_numbers = #tpu.dot_dimension_numbers<[1], [0], [0], [1], [0, 0, 1, 1], [], []>} : vector<64x128xbf16>, vector<128x128xbf16>, vector<64x128xf32> -> vector<64x128xf32>
    %c2 = arith.constant 2 : index
    %c0_16 = arith.constant 0 : index
    %31 = vector.load %arg3[%c2, %c0_16] : memref<5x128xf32, #tpu.memory_space<vmem>>, vector<1x128xf32>
    %c3 = arith.constant 3 : index
    %c0_17 = arith.constant 0 : index
    %32 = vector.load %arg3[%c3, %c0_17] : memref<5x128xf32, #tpu.memory_space<vmem>>, vector<1x128xf32>
    %cst_18 = arith.constant dense<0.000000e+00> : vector<128xf32>
    %33 = vector.multi_reduction <add>, %30, %cst_18 [0] : vector<64x128xf32> to vector<128xf32>
    %34 = vector.shape_cast %33 : vector<128xf32> to vector<1x128xf32>
    %cst_19 = arith.constant 6.400000e+01 : f32
    %35 = vector.broadcast %cst_19 : f32 to vector<1x128xf32>
    %36 = arith.divf %34, %35 : vector<1x128xf32>
    %37 = vector.broadcast %36 : vector<1x128xf32> to vector<64x128xf32>
    %38 = arith.subf %30, %37 : vector<64x128xf32>
    %39 = arith.mulf %38, %38 : vector<64x128xf32>
    %cst_20 = arith.constant dense<0.000000e+00> : vector<128xf32>
    %40 = vector.multi_reduction <add>, %39, %cst_20 [0] : vector<64x128xf32> to vector<128xf32>
    %41 = vector.shape_cast %40 : vector<128xf32> to vector<1x128xf32>
    %cst_21 = arith.constant 6.400000e+01 : f32
    %42 = vector.broadcast %cst_21 : f32 to vector<1x128xf32>
    %43 = arith.divf %41, %42 : vector<1x128xf32>
    %cst_22 = arith.constant 9.99999974E-6 : f32
    %44 = vector.broadcast %cst_22 : f32 to vector<1x128xf32>
    %45 = arith.addf %43, %44 : vector<1x128xf32>
    %46 = math.rsqrt %45 : vector<1x128xf32>
    %47 = arith.mulf %31, %46 : vector<1x128xf32>
    %48 = vector.broadcast %47 : vector<1x128xf32> to vector<64x128xf32>
    %49 = arith.mulf %38, %48 : vector<64x128xf32>
    %50 = vector.broadcast %32 : vector<1x128xf32> to vector<64x128xf32>
    %51 = arith.addf %49, %50 : vector<64x128xf32>
    %cst_23 = arith.constant 0.000000e+00 : f32
    %52 = vector.broadcast %cst_23 : f32 to vector<64x128xf32>
    %53 = arith.maximumf %51, %52 : vector<64x128xf32>
    %c1_24 = arith.constant 1 : index
    %c0_25 = arith.constant 0 : index
    %c0_26 = arith.constant 0 : index
    %54 = vector.load %arg2[%c1_24, %c0_25, %c0_26] : memref<2x128x128xbf16, #tpu.memory_space<vmem>>, vector<1x128x128xbf16>
    %55 = vector.shape_cast %54 : vector<1x128x128xbf16> to vector<128x128xbf16>
    %c4 = arith.constant 4 : index
    %c0_27 = arith.constant 0 : index
    %56 = vector.load %arg3[%c4, %c0_27] : memref<5x128xf32, #tpu.memory_space<vmem>>, vector<1x128xf32>
    %57 = arith.truncf %53 : vector<64x128xf32> to vector<64x128xbf16>
    %cst_28 = arith.constant dense<0.000000e+00> : vector<64x128xf32>
    %58 = tpu.matmul %57, %55, %cst_28 {dimension_numbers = #tpu.dot_dimension_numbers<[1], [0], [0], [1], [0, 0, 1, 1], [], []>} : vector<64x128xbf16>, vector<128x128xbf16>, vector<64x128xf32> -> vector<64x128xf32>
    %59 = vector.broadcast %56 : vector<1x128xf32> to vector<64x128xf32>
    %60 = arith.addf %58, %59 : vector<64x128xf32>
    %c0_29 = arith.constant 0 : index
    %c0_30 = arith.constant 0 : index
    %61 = vector.load %arg4[%c0_29, %c0_30] : memref<64x128xf32, #tpu.memory_space<vmem>>, vector<64x128xf32>
    tpu.vector_store %arg4[%c0_29, %c0_30], %60 {strides = array<i32>} : memref<64x128xf32, #tpu.memory_space<vmem>>, vector<64x128xf32>,
    return
  }
}

</mosaic_0001>

<bundles_post_ra>
// kernel: mlp_egc_forward.1
= control target key start
LH: loop header
LB: loop body
LE: loop exit
PB: predicated region body
PF: predicated region fallthrough
CT: control target
= control target key end

     0   :  { %9 = vsyncpa [#allocation3], 0  ;;  %s750_s15 = smov [#allocation2]   ;;  %s870_s0 = inlined_call_operand.vmem [shape: f32[64,32], index: 0, kind: input, shape index: {}]   ;;  %s871_s1 = inlined_call_operand.vmem [shape: bf16[32,128], index: 1, kind: input, shape index: {}]   ;;  %s872_s2 = inlined_call_operand.hbm [shape: bf16[2,128,128], index: 2, kind: input, shape index: {}]   ;;  %s873_s3 = inlined_call_operand.vmem [shape: f32[5,128], index: 3, kind: input, shape index: {}]   ;;  %s874_s4 = inlined_call_operand.vmem [shape: f32[64,128], index: 4, kind: output, shape index: {}]  }
   0x1   :  { %s19_s16 = sshll.u32 %s750_s15, 4  ;;  %s726_s19 = scalar_lea.hbm %s872_s2, 2048  ;;  %s20_s16 = int_to_ptr.vmem [resolvable:$true] %s19_s16 }
   0x2   :  { %p727_p0 = scmp.ne.s32.totalorder %s872_s2, %s726_s19  ;;  %p730_p1 = scmp.lt.u32.totalorder %s726_s19, %s872_s2 }
   0x4   :  { %p732_p2 = pnand %p730_p1, %p727_p0 }
   0x6   :  { %735 = shalt.err (!%p732_p2)
}
   0x7   :  { %s736_s24 = scalar_lea.vmem %s20_s16, 2048  ;;  %p741_p4 = scmp.lt.s32.totalorder %s20_s16, %s20_s16 }
   0x8   :  { %p737_p3 = scmp.ne.s32.totalorder %s20_s16, %s736_s24  ;;  %p742_p5 = scmp.lt.s32.totalorder %s736_s24, %s736_s24 }
   0xa   :  { %p743_p6 = por %p742_p5, %p741_p4 }
   0xc   :  { %p744_p7 = pnand %p743_p6, %p737_p3 }
   0xe   :  { %747 = shalt.err (!%p744_p7)
}
   0xf   :  { %s751_s25 = smov 64   ;;  %s752_s26 = smov 4  }
  0x10   :  { %25 = dma.hbm_to_vmem [thread:$0]  %s872_s2, 2048, %s20_s16, [#allocation3], %s751_s25, %s751_s25, %s752_s26  }
  0x11   :  { %748 = dma.done.wait [#allocation3], 2048  }
  0x12   :  { %749 = vsyncadd [#allocation3], 4294965248  ;;  %v704_v0 = vld [vmem:[%s871_s1] sm:$0xff]   ;;  %v705_v1 = vld [vmem:[%s871_s1 + $0x8] sm:$0xff]   ;;  %vm60_vm0 = vcmask 261120  }
  0x13   :  { %641 = vmatprep.subr.bf16.mxu0 %v704_v0  ;;  %v32_v2 = vld [vmem:[%s870_s0] sm:$0xff]  ;;  %v33_v3 = vld [vmem:[%s870_s0 + $0x8] sm:$0xff]  ;;  %v34_v5 = vld [vmem:[%s870_s0 + $0x10] sm:$0xff] }
  0x14   :  { %642 = vmatpush3.bf16.msra.mxu0 %v704_v0  ;;  %v44_v4 = vpack.c.bf16 %v33_v3, %v32_v2  ;;  %v35_v6 = vld [vmem:[%s870_s0 + $0x18] sm:$0xff]  ;;  %v36_v7 = vld [vmem:[%s870_s0 + $0x20] sm:$0xff]  ;;  %v37_v8 = vld [vmem:[%s870_s0 + $0x28] sm:$0xff] }
  0x15   :  { %643 = vmatprep.subr.bf16.mxu0 %v705_v1  ;;  %v45_v9 = vpack.c.bf16 %v35_v6, %v34_v5  ;;  %v46_v10 = vpack.c.bf16 %v37_v8, %v36_v7  ;;  %v38_v11 = vld [vmem:[%s870_s0 + $0x30] sm:$0xff]  ;;  %v39_v12 = vld [vmem:[%s870_s0 + $0x38] sm:$0xff]  ;;  %v706_v14 = vld [vmem:[#allocation2] sm:$0xff]  }
  0x16   :  { %645 = vmatprep.mubr.msk.bf16.mxu0 %vm60_vm0, %v44_v4  ;;  %v47_v13 = vpack.c.bf16 %v39_v12, %v38_v11  ;;  %653 = vmatprep.subr.bf16.mxu1 %v706_v14  ;;  %v707_v15 = vld [vmem:[#allocation2 + $0x8] sm:$0xff]   ;;  %v708_v16 = vld [vmem:[#allocation2 + $0x10] sm:$0xff]   ;;  %v709_v17 = vld [vmem:[#allocation2 + $0x18] sm:$0xff]   ;;  %v188_v11 = vlaneseq }
  0x17   :  { %654 = vmatpush3.bf16.msra.mxu1 %v706_v14  ;;  %v710_v18 = vld [vmem:[#allocation2 + $0x20] sm:$0xff]   ;;  %v711_v19 = vld [vmem:[#allocation2 + $0x28] sm:$0xff]   ;;  %v712_v20 = vld [vmem:[#allocation2 + $0x30] sm:$0xff]  }
  0x18   :  { %644 = vmatpush3.bf16.msra.mxu0 %v705_v1  ;;  %655 = vmatprep.subr.bf16.mxu1 %v707_v15  ;;  %v713_v21 = vld [vmem:[#allocation2 + $0x38] sm:$0xff]   ;;  %v824_v12 = vshrl.u32 %v188_v11, 7 }
  0x1a   :  { %v190_v14 = vsub.s32 0, %v824_v12 }
  0x1b   :  { %646 = vmatmul.mubr.msk.bf16.vlgmr.msra.gmra.mrb[0].mxu0 %vm60_vm0, %v45_v9  ;;  %656 = vmatpush3.bf16.msra.mxu1 %v707_v15 }
  0x1c   :  { %649 = vmatprep.mubr.msk.bf16.mxu0 %vm60_vm0, %v46_v10  ;;  %657 = vmatprep.subr.bf16.mxu1 %v708_v16 }
  0x1f   :  { %658 = vmatpush3.bf16.msra.mxu1 %v708_v16 }
  0x20   :  { %659 = vmatprep.subr.bf16.mxu1 %v709_v17 }
  0x23   :  { %650 = vmatmul.mubr.msk.bf16.gmra.mrb[4].mxu0 %vm60_vm0, %v47_v13  ;;  %660 = vmatpush3.bf16.msra.mxu1 %v709_v17  ;;  %v138_v13 = vld [vmem:[%s873_s3] sm:$0x1] }
  0x24   :  { %661 = vmatprep.subr.bf16.mxu1 %v710_v18 }
  0x27   :  { %662 = vmatpush3.bf16.msra.mxu1 %v710_v18  ;;  %v592_v18 = vld [vmem:[%s873_s3 + $0x1] ss:$0 sm:$0xff] }
  0x28   :  { %663 = vmatprep.subr.bf16.mxu1 %v711_v19 }
  0x2b   :  { %664 = vmatpush3.bf16.msra.mxu1 %v711_v19 }
  0x2c   :  { %665 = vmatprep.subr.bf16.mxu1 %v712_v20 }
  0x2f   :  { %666 = vmatpush3.bf16.msra.mxu1 %v712_v20 }
  0x30   :  { %667 = vmatprep.subr.bf16.mxu1 %v713_v21 }
  0x33   :  { %668 = vmatpush3.bf16.msra.mxu1 %v713_v21 }
  0xee   :  { %v647_v22 = vpop.f32.mrb[0].mxu0 }
  0xef   :  { %v107_v23 = vpop.f32.mrb[1].mxu0 }
  0xf0   :  { %v648_v24 = vpop.f32.mrb[2].mxu0 }
  0xf1   :  { %v110_v25 = vpop.f32.mrb[3].mxu0 }
  0xf2   :  { %v140_v26 = vadd.f32 %v110_v25, %v107_v23 }
  0xf4   :  { %v141_v27 = vadd.f32 %v647_v22, %v140_v26 }
  0xf6   :  { %v651_v28 = vpop.f32.mrb[4].mxu0  ;;  %v142_v29 = vadd.f32 %v648_v24, %v141_v27 }
  0xf7   :  { %v123_v30 = vpop.f32.mrb[5].mxu0 }
  0xf8   :  { %v143_v31 = vadd.f32 %v142_v29, %v123_v30  ;;  %v652_v32 = vpop.f32.mrb[6].mxu0 }
  0xf9   :  { %v126_v33 = vpop.f32.mrb[7].mxu0 }
  0xfa   :  { %v144_v34 = vadd.f32 %v143_v31, %v126_v33 }
  0xfc   :  { %v145_v35 = vadd.f32 %v651_v28, %v144_v34 }
  0xfe   :  { %v146_v36 = vadd.f32 %v652_v32, %v145_v35 }
 0x100   :  { %v147_v37 = vrot.slane %v146_v36, 4 }
 0x102   :  { %v148_v38 = vadd.f32 %v147_v37, %v146_v36 }
 0x104   :  { %v149_v39 = vrot.slane %v148_v38, 2 }
 0x106   :  { %v150_v40 = vadd.f32 %v149_v39, %v148_v38 }
 0x108   :  { %v151_v41 = vrot.slane %v150_v40, 1 }
 0x10a   :  { %v152_v42 = vadd.f32 %v151_v41, %v150_v40 }
 0x10c   :  { %v154_v43 = vmul.f32 0.015625, %v152_v42 }
 0x10e   :  { %v155_v44 = vsub.f32 %v107_v23, %v154_v43  ;;  %v156_v45 = vsub.f32 %v110_v25, %v154_v43  ;;  %v157_v46 = vsub.f32 %v647_v22, %v154_v43  ;;  %v158_v47 = vsub.f32 %v648_v24, %v154_v43 }
 0x10f   :  { %v159_v48 = vsub.f32 %v123_v30, %v154_v43  ;;  %v160_v49 = vsub.f32 %v126_v33, %v154_v43  ;;  %v161_v50 = vsub.f32 %v651_v28, %v154_v43  ;;  %v162_v51 = vsub.f32 %v652_v32, %v154_v43 }
 0x110   :  { %v163_v52 = vmul.f32 %v155_v44, %v155_v44  ;;  %v164_v53 = vmul.f32 %v156_v45, %v156_v45  ;;  %v165_v54 = vmul.f32 %v157_v46, %v157_v46  ;;  %v166_v56 = vmul.f32 %v158_v47, %v158_v47 }
 0x111   :  { %v167_v58 = vmul.f32 %v159_v48, %v159_v48  ;;  %v168_v60 = vmul.f32 %v160_v49, %v160_v49  ;;  %v169_v62 = vmul.f32 %v161_v50, %v161_v50  ;;  %v170_v0 = vmul.f32 %v162_v51, %v162_v51 }
 0x112   :  { %v171_v55 = vadd.f32 %v164_v53, %v163_v52  ;;  %v719_v52 = vld [vmem:[#allocation2 + $0x68] sm:$0xff]   ;;  %v720_v53 = vld [vmem:[#allocation2 + $0x70] sm:$0xff]  }
 0x114   :  { %v172_v57 = vadd.f32 %v171_v55, %v165_v54  ;;  %v721_v54 = vld [vmem:[#allocation2 + $0x78] sm:$0xff]  }
 0x116   :  { %v173_v59 = vadd.f32 %v172_v57, %v166_v56 }
 0x118   :  { %v174_v61 = vadd.f32 %v173_v59, %v167_v58 }
 0x11a   :  { %v175_v63 = vadd.f32 %v174_v61, %v168_v60 }
 0x11c   :  { %v176_v1 = vadd.f32 %v175_v63, %v169_v62 }
 0x11e   :  { %v177_v2 = vadd.f32 %v176_v1, %v170_v0 }
 0x120   :  { %v178_v3 = vrot.slane %v177_v2, 4 }
 0x122   :  { %v179_v4 = vadd.f32 %v178_v3, %v177_v2 }
 0x124   :  { %v180_v5 = vrot.slane %v179_v4, 2 }
 0x126   :  { %v181_v6 = vadd.f32 %v180_v5, %v179_v4 }
 0x128   :  { %v182_v7 = vrot.slane %v181_v6, 1 }
 0x12a   :  { %v183_v8 = vadd.f32 %v182_v7, %v181_v6 }
 0x12c   :  { %v184_v9 = vmul.f32 0.015625, %v183_v8 }
 0x12e   :  { %v185_v10 = vadd.f32 1e-05, %v184_v9 }
 0x130   :  { %722 = vrsqrt.f32 %v185_v10 }
 0x13a   :  { %v723_v15 = vpop.eup %722 }
 0x13b   :  { %v187_v16 = vmul.f32 %v723_v15, %v138_v13 }
 0x13d   :  { %v191_v17 = vrot.slane %v187_v16, %v190_v14 }
 0x13f   :  { %v197_v19 = vmul.f32 %v191_v17, %v160_v49  ;;  %v192_v20 = vmul.f32 %v191_v17, %v155_v44  ;;  %v193_v21 = vmul.f32 %v191_v17, %v156_v45  ;;  %v194_v22 = vmul.f32 %v191_v17, %v157_v46  ;;  %v716_v49 = vld [vmem:[#allocation2 + $0x50] sm:$0xff]  }
 0x140   :  { %v195_v23 = vmul.f32 %v191_v17, %v158_v47  ;;  %v196_v24 = vmul.f32 %v191_v17, %v159_v48  ;;  %v198_v25 = vmul.f32 %v191_v17, %v161_v50  ;;  %v199_v26 = vmul.f32 %v191_v17, %v162_v51  ;;  %v714_v47 = vld [vmem:[#allocation2 + $0x40] sm:$0xff]   ;;  %v715_v48 = vld [vmem:[#allocation2 + $0x48] sm:$0xff]   ;;  %v717_v50 = vld [vmem:[#allocation2 + $0x58] sm:$0xff]  }
 0x141   :  { %v209_v27 = vadd.f32 %v592_v18, %v197_v19  ;;  %v204_v28 = vadd.f32 %v592_v18, %v192_v20  ;;  %v205_v29 = vadd.f32 %v592_v18, %v193_v21  ;;  %v206_v30 = vadd.f32 %v592_v18, %v194_v22  ;;  %677 = vmatprep.subr.bf16.mxu0 %v714_v47  ;;  %v718_v51 = vld [vmem:[#allocation2 + $0x60] sm:$0xff]  }
 0x142   :  { %v207_v31 = vadd.f32 %v592_v18, %v195_v23  ;;  %v208_v32 = vadd.f32 %v592_v18, %v196_v24  ;;  %v210_v33 = vadd.f32 %v592_v18, %v198_v25  ;;  %v211_v34 = vadd.f32 %v592_v18, %v199_v26  ;;  %678 = vmatpush3.bf16.msra.mxu0 %v714_v47 }
 0x143   :  { %v212_v35 = vmax.f32 %v204_v28, 0.0  ;;  %v213_v36 = vmax.f32 %v205_v29, 0.0  ;;  %v214_v37 = vmax.f32 %v206_v30, 0.0  ;;  %v217_v38 = vmax.f32 %v209_v27, 0.0  ;;  %679 = vmatprep.subr.bf16.mxu0 %v715_v48 }
 0x144   :  { %v215_v39 = vmax.f32 %v207_v31, 0.0  ;;  %v216_v40 = vmax.f32 %v208_v32, 0.0  ;;  %v218_v41 = vmax.f32 %v210_v33, 0.0  ;;  %v219_v42 = vmax.f32 %v211_v34, 0.0 }
 0x145   :  { %v236_v43 = vpack.c.bf16 %v213_v36, %v212_v35 }
 0x146   :  { %v237_v44 = vpack.c.bf16 %v215_v39, %v214_v37  ;;  %v238_v45 = vpack.c.bf16 %v217_v38, %v216_v40  ;;  %v239_v46 = vpack.c.bf16 %v219_v42, %v218_v41  ;;  %680 = vmatpush3.bf16.msra.mxu0 %v715_v48 }
 0x147   :  { %669 = vmatprep.mubr.bf16.mxu1 %v236_v43  ;;  %681 = vmatprep.subr.bf16.mxu0 %v716_v49 }
 0x148   :  { %670 = vmatmul.mubr.bf16.vlgmr.msra.gmra.mrb[0].mxu1 %v237_v44 }
 0x149   :  { %673 = vmatprep.mubr.bf16.mxu1 %v238_v45 }
 0x14a   :  { %682 = vmatpush3.bf16.msra.mxu0 %v716_v49 }
 0x14b   :  { %683 = vmatprep.subr.bf16.mxu0 %v717_v50 }
 0x14e   :  { %684 = vmatpush3.bf16.msra.mxu0 %v717_v50  ;;  %v601_v50 = vld [vmem:[%s873_s3 + $0x3] ss:$0 sm:$0xff] }
 0x14f   :  { %685 = vmatprep.subr.bf16.mxu0 %v718_v51 }
 0x150   :  { %674 = vmatmul.mubr.bf16.gmra.mrb[4].mxu1 %v239_v46  ;;  %v353_v46 = vld [vmem:[%s873_s3 + $0x2] sm:$0x1] }
 0x152   :  { %686 = vmatpush3.bf16.msra.mxu0 %v718_v51 }
 0x153   :  { %687 = vmatprep.subr.bf16.mxu0 %v719_v52 }
 0x156   :  { %688 = vmatpush3.bf16.msra.mxu0 %v719_v52 }
 0x157   :  { %689 = vmatprep.subr.bf16.mxu0 %v720_v53 }
 0x15a   :  { %690 = vmatpush3.bf16.msra.mxu0 %v720_v53 }
 0x15b   :  { %691 = vmatprep.subr.bf16.mxu0 %v721_v54 }
 0x15e   :  { %692 = vmatpush3.bf16.msra.mxu0 %v721_v54 }
 0x21b   :  { %v671_v55 = vpop.f32.mrb[0].mxu1 }
 0x21c   :  { %v322_v56 = vpop.f32.mrb[1].mxu1 }
 0x21d   :  { %v672_v57 = vpop.f32.mrb[2].mxu1 }
 0x21e   :  { %v325_v58 = vpop.f32.mrb[3].mxu1 }
 0x21f   :  { %v355_v59 = vadd.f32 %v325_v58, %v322_v56 }
 0x221   :  { %v356_v60 = vadd.f32 %v671_v55, %v355_v59 }
 0x223   :  { %v675_v61 = vpop.f32.mrb[4].mxu1  ;;  %v357_v62 = vadd.f32 %v672_v57, %v356_v60 }
 0x224   :  { %v338_v63 = vpop.f32.mrb[5].mxu1 }
 0x225   :  { %v358_v0 = vadd.f32 %v357_v62, %v338_v63  ;;  %v676_v1 = vpop.f32.mrb[6].mxu1 }
 0x226   :  { %v341_v2 = vpop.f32.mrb[7].mxu1 }
 0x227   :  { %v359_v3 = vadd.f32 %v358_v0, %v341_v2 }
 0x229   :  { %v360_v4 = vadd.f32 %v675_v61, %v359_v3 }
 0x22b   :  { %v361_v5 = vadd.f32 %v676_v1, %v360_v4 }
 0x22d   :  { %v362_v6 = vrot.slane %v361_v5, 4 }
 0x22f   :  { %v363_v7 = vadd.f32 %v362_v6, %v361_v5 }
 0x231   :  { %v364_v8 = vrot.slane %v363_v7, 2 }
 0x233   :  { %v365_v9 = vadd.f32 %v364_v8, %v363_v7 }
 0x235   :  { %v366_v10 = vrot.slane %v365_v9, 1 }
 0x237   :  { %v367_v11 = vadd.f32 %v366_v10, %v365_v9 }
 0x239   :  { %v368_v13 = vmul.f32 0.015625, %v367_v11 }
 0x23b   :  { %v369_v15 = vsub.f32 %v322_v56, %v368_v13  ;;  %v370_v16 = vsub.f32 %v325_v58, %v368_v13  ;;  %v371_v17 = vsub.f32 %v671_v55, %v368_v13  ;;  %v372_v18 = vsub.f32 %v672_v57, %v368_v13 }
 0x23c   :  { %v373_v19 = vsub.f32 %v338_v63, %v368_v13  ;;  %v374_v20 = vsub.f32 %v341_v2, %v368_v13  ;;  %v375_v21 = vsub.f32 %v675_v61, %v368_v13  ;;  %v376_v22 = vsub.f32 %v676_v1, %v368_v13 }
 0x23d   :  { %v377_v23 = vmul.f32 %v369_v15, %v369_v15  ;;  %v378_v24 = vmul.f32 %v370_v16, %v370_v16  ;;  %v379_v25 = vmul.f32 %v371_v17, %v371_v17  ;;  %v380_v27 = vmul.f32 %v372_v18, %v372_v18 }
 0x23e   :  { %v381_v29 = vmul.f32 %v373_v19, %v373_v19  ;;  %v382_v31 = vmul.f32 %v374_v20, %v374_v20  ;;  %v383_v33 = vmul.f32 %v375_v21, %v375_v21  ;;  %v384_v35 = vmul.f32 %v376_v22, %v376_v22 }
 0x23f   :  { %v385_v26 = vadd.f32 %v378_v24, %v377_v23 }
 0x241   :  { %v386_v28 = vadd.f32 %v385_v26, %v379_v25 }
 0x243   :  { %v387_v30 = vadd.f32 %v386_v28, %v380_v27 }
 0x245   :  { %v388_v32 = vadd.f32 %v387_v30, %v381_v29 }
 0x247   :  { %v389_v34 = vadd.f32 %v388_v32, %v382_v31 }
 0x249   :  { %v390_v36 = vadd.f32 %v389_v34, %v383_v33 }
 0x24b   :  { %v391_v37 = vadd.f32 %v390_v36, %v384_v35 }
 0x24d   :  { %v392_v38 = vrot.slane %v391_v37, 4 }
 0x24f   :  { %v393_v39 = vadd.f32 %v392_v38, %v391_v37 }
 0x251   :  { %v394_v40 = vrot.slane %v393_v39, 2 }
 0x253   :  { %v395_v41 = vadd.f32 %v394_v40, %v393_v39 }
 0x255   :  { %v396_v42 = vrot.slane %v395_v41, 1 }
 0x257   :  { %v397_v43 = vadd.f32 %v396_v42, %v395_v41 }
 0x259   :  { %v398_v44 = vmul.f32 0.015625, %v397_v43 }
 0x25b   :  { %v399_v45 = vadd.f32 1e-05, %v398_v44 }
 0x25d   :  { %724 = vrsqrt.f32 %v399_v45 }
 0x267   :  { %v725_v47 = vpop.eup %724 }
 0x268   :  { %v401_v48 = vmul.f32 %v725_v47, %v353_v46 }
 0x26a   :  { %v405_v49 = vrot.slane %v401_v48, %v190_v14 }
 0x26c   :  { %v409_v51 = vmul.f32 %v405_v49, %v372_v18  ;;  %v411_v52 = vmul.f32 %v405_v49, %v374_v20  ;;  %v406_v53 = vmul.f32 %v405_v49, %v369_v15  ;;  %v407_v54 = vmul.f32 %v405_v49, %v370_v16  ;;  %v602_v15 = vld [vmem:[%s873_s3 + $0x4] ss:$0 sm:$0xff] }
 0x26d   :  { %v408_v55 = vmul.f32 %v405_v49, %v371_v17  ;;  %v410_v56 = vmul.f32 %v405_v49, %v373_v19  ;;  %v412_v57 = vmul.f32 %v405_v49, %v375_v21  ;;  %v413_v58 = vmul.f32 %v405_v49, %v376_v22 }
 0x26e   :  { %v423_v59 = vadd.f32 %v601_v50, %v411_v52  ;;  %v418_v60 = vadd.f32 %v601_v50, %v406_v53  ;;  %v419_v61 = vadd.f32 %v601_v50, %v407_v54  ;;  %v421_v62 = vadd.f32 %v601_v50, %v409_v51 }
 0x26f   :  { %v420_v63 = vadd.f32 %v601_v50, %v408_v55  ;;  %v422_v0 = vadd.f32 %v601_v50, %v410_v56  ;;  %v424_v12 = vadd.f32 %v601_v50, %v412_v57  ;;  %v425_v14 = vadd.f32 %v601_v50, %v413_v58 }
 0x270   :  { %v431_v1 = vmax.f32 %v423_v59, 0.0  ;;  %v426_v2 = vmax.f32 %v418_v60, 0.0  ;;  %v427_v3 = vmax.f32 %v419_v61, 0.0  ;;  %v429_v4 = vmax.f32 %v421_v62, 0.0 }
 0x271   :  { %v428_v5 = vmax.f32 %v420_v63, 0.0  ;;  %v430_v6 = vmax.f32 %v422_v0, 0.0  ;;  %v432_v7 = vmax.f32 %v424_v12, 0.0  ;;  %v433_v8 = vmax.f32 %v425_v14, 0.0 }
 0x272   :  { %v452_v9 = vpack.c.bf16 %v427_v3, %v426_v2 }
 0x273   :  { %v453_v10 = vpack.c.bf16 %v429_v4, %v428_v5  ;;  %v454_v11 = vpack.c.bf16 %v431_v1, %v430_v6  ;;  %v455_v13 = vpack.c.bf16 %v433_v8, %v432_v7 }
 0x274   :  { %693 = vmatprep.mubr.bf16.mxu0 %v452_v9 }
 0x275   :  { %694 = vmatmul.mubr.bf16.vlgmr.msra.gmra.mrb[8].mxu0 %v453_v10 }
 0x276   :  { %697 = vmatprep.mubr.bf16.mxu0 %v454_v11 }
 0x27d   :  { %698 = vmatmul.mubr.bf16.gmra.mrb[12].mxu0 %v455_v13 }
 0x348   :  { %v695_v16 = vpop.f32.mrb[8].mxu0 }
 0x349   :  { %v551_v17 = vadd.f32 %v695_v16, %v602_v15  ;;  %v542_v18 = vpop.f32.mrb[9].mxu0 }
 0x34a   :  { %v543_v19 = vadd.f32 %v602_v15, %v542_v18  ;;  %v696_v20 = vpop.f32.mrb[10].mxu0 }
 0x34b   :  { %575 = vst [vmem:[%s874_s4 + $0x10] sm:$0xff] %v551_v17  ;;  %v554_v21 = vadd.f32 %v696_v20, %v602_v15  ;;  %v545_v22 = vpop.f32.mrb[11].mxu0 }
 0x34c   :  { %573 = vst [vmem:[%s874_s4] sm:$0xff] %v543_v19  ;;  %v546_v23 = vadd.f32 %v602_v15, %v545_v22 }
 0x34d   :  { %576 = vst [vmem:[%s874_s4 + $0x18] sm:$0xff] %v554_v21 }
 0x34e   :  { %574 = vst [vmem:[%s874_s4 + $0x8] sm:$0xff] %v546_v23 }
 0x350   :  { %v699_v24 = vpop.f32.mrb[12].mxu0 }
 0x351   :  { %v567_v25 = vadd.f32 %v699_v24, %v602_v15  ;;  %v558_v26 = vpop.f32.mrb[13].mxu0 }
 0x352   :  { %v559_v27 = vadd.f32 %v602_v15, %v558_v26  ;;  %v700_v28 = vpop.f32.mrb[14].mxu0 }
 0x353   :  { %579 = vst [vmem:[%s874_s4 + $0x30] sm:$0xff] %v567_v25  ;;  %v570_v29 = vadd.f32 %v700_v28, %v602_v15  ;;  %v561_v30 = vpop.f32.mrb[15].mxu0 }
 0x354   :  { %577 = vst [vmem:[%s874_s4 + $0x20] sm:$0xff] %v559_v27  ;;  %v562_v31 = vadd.f32 %v602_v15, %v561_v30 }
 0x355   :  { %580 = vst [vmem:[%s874_s4 + $0x38] sm:$0xff] %v570_v29 }
 0x356   :  { %578 = vst [vmem:[%s874_s4 + $0x28] sm:$0xff] %v562_v31 }
 0x357   :  { %585 = vsyncpa [#allocation3], 1 }

</bundles_post_ra>
